<compile_context>
chip_gen: v7x
topology: tpu7x:2x2x1
jax: 0.10.0
libtpu: 0.0.40
codegen_flags: <defaults>
</compile_context>

<pallas_src>
import functools

import jax
import jax.numpy as jnp
import numpy as np
from jax.experimental import pallas as pl
from jax.experimental.pallas import tpu as pltpu


def _round_up(x, m):
    return (x + m - 1) // m * m


# ----------------------------------------------------------------------------
# Fused kernel: stem matmul+SiLU -> pointwise matmul+SiLU -> pool accumulate
#               -> (last tile) heads matmul
# grid = (B, T) ; T = spatial tiles of TM rows each (reduction axis, last)
# ----------------------------------------------------------------------------
def _fused_backbone_heads_kernel(cols_ref, sw_ref, sb_ref, pw_ref, pb_ref,
                                 hw_ref, hb_ref, o_ref, acc_ref,
                                 *, hw_valid, tm, need_mask, bf16_silu):
    t = pl.program_id(1)
    last = pl.num_programs(1) - 1

    @pl.when(t == 0)
    def _init():
        acc_ref[...] = jnp.zeros_like(acc_ref)

    # Stem conv as im2col matmul (bf16 MXU, f32 accumulate) + bias + SiLU.
    x = cols_ref[...]                                               # (TM, K) bf16
    y = jnp.dot(x, sw_ref[...], preferred_element_type=jnp.float32)
    y = y + sb_ref[...]
    if bf16_silu:
        # v6e/v7x: native bf16 VPU/EUP; result is bf16-quantized for the MXU anyway.
        y = y.astype(jnp.bfloat16)
        y = y * jax.nn.sigmoid(y)
    else:
        # v5e/v4: no bf16 VPU/EUP -> keep SiLU in f32, cast only for the matmul.
        y = (y * jax.nn.sigmoid(y)).astype(jnp.bfloat16)

    # Pointwise 1x1 conv (bf16 MXU) + bias + SiLU (f32, feeds f32 accumulator).
    f = jnp.dot(y, pw_ref[...], preferred_element_type=jnp.float32)
    f = f + pb_ref[...]
    f = f * jax.nn.sigmoid(f)                                       # (TM, F_pad) f32

    # Column-sum accumulate for the global average pool.  (8, F_pad) accumulator:
    # per-step reduce is plain VALU vreg adds; the cross-sublane reduce happens
    # once in _finalize.
    def _accumulate(vals):
        acc_ref[...] += jnp.sum(vals.reshape(tm // 8, 8, vals.shape[-1]), axis=0)

    if need_mask:
        # Spatial-padding rows only exist in the last tile: gate the mask there.
        @pl.when(t != last)
        def _acc_plain():
            _accumulate(f)

        @pl.when(t == last)
        def _acc_masked():
            row = t * tm + jax.lax.broadcasted_iota(jnp.int32, f.shape, 0)
            _accumulate(jnp.where(row < hw_valid, f, 0.0))
    else:
        _accumulate(f)

    @pl.when(t == last)
    def _finalize():
        # One cross-sublane reduce for the whole spatial loop, then f32 heads.
        pooled = jnp.sum(acc_ref[...], axis=0, keepdims=True) * (1.0 / hw_valid)
        out = jnp.dot(pooled, hw_ref[...],
                      preferred_element_type=jnp.float32) + hb_ref[...]
        o_ref[...] = out[None, :, :].astype(o_ref.dtype)            # (1, 1, D_pad)


# ----------------------------------------------------------------------------
# Hydrant forward (eval mode): backbone -> (yaw, pitch, yaw_reg, pitch_reg)
# ----------------------------------------------------------------------------
@functools.partial(jax.jit,
                   static_argnames=("num_bins_yaw", "num_bins_pitch", "tile_m"))
def hydrant_forward(x_nchw, params, num_bins_yaw, num_bins_pitch, tile_m=None):
    B, C, H, W = x_nchw.shape
    assert H % 2 == 0 and W % 2 == 0  # TODO(synk): odd spatial sizes for stride-2 stem
    Ho, Wo = H // 2, W // 2
    HW = Ho * Wo
    K = 9 * C

    # im2col for the 3x3/s2/p1 stem conv.  Cast to bf16 BEFORE the transpose/pad/
    # slice/concat chain so every wrapper pass and the HBM slab are half-width.
    x = jnp.transpose(x_nchw.astype(jnp.bfloat16), (0, 2, 3, 1))    # NHWC bf16
    xp = jnp.pad(x, ((0, 0), (1, 1), (1, 1), (0, 0)))
    patches = [xp[:, ky:ky + 2 * Ho:2, kx:kx + 2 * Wo:2, :]
               for ky in range(3) for kx in range(3)]
    cols = jnp.concatenate(patches, axis=-1).reshape(B, HW, K)      # bf16

    # Spatial tiling: big tiles (multiple of 16 for bf16 sublane packing) amortize
    # the per-grid-step overhead; VMEM footprint stays tiny even at TM=2048.
    TM = tile_m if tile_m is not None else min(2048, _round_up(HW, 16))
    assert TM % 16 == 0
    HW_pad = _round_up(HW, TM)
    T = HW_pad // TM
    if HW_pad != HW:
        # Zero rows; fused with the bf16 concat write by XLA (single slab pass).
        cols = jnp.pad(cols, ((0, 0), (0, HW_pad - HW), (0, 0)))

    sw, sb = params["stem_w"], params["stem_b"]
    pw, pb = params["pw_w"], params["pw_b"]
    hw_w, hb = params["heads_w"], params["heads_b"]
    Cs_pad = sw.shape[1]
    F_pad = pw.shape[1]
    D_pad = hw_w.shape[1]

    # bf16 SiLU only where the VPU/EUP are natively bf16 (v6e / v7x).
    kind = jax.devices()[0].device_kind.lower()
    bf16_silu = ("v6" in kind) or ("v7" in kind)

    kernel = functools.partial(_fused_backbone_heads_kernel,
                               hw_valid=HW, tm=TM,
                               need_mask=(HW_pad != HW), bf16_silu=bf16_silu)

    out = pl.pallas_call(
        kernel,
        out_shape=jax.ShapeDtypeStruct((B, 1, D_pad), jnp.float32),
        grid_spec=pltpu.PrefetchScalarGridSpec(
            num_scalar_prefetch=0,
            grid=(B, T),
            in_specs=[
                # Leading batch dim squeezed out of the kernel view.
                pl.BlockSpec((None, TM, K), lambda b, t: (b, t, 0)),   # im2col tile
                # Constant-index weights/biases stay VMEM-resident across the grid.
                # TODO(synk): pipeline_mode=pl.Buffered(1) would drop their double
                # buffers; kept at default buffering for lowering robustness.
                pl.BlockSpec((K, Cs_pad), lambda b, t: (0, 0)),        # stem W
                pl.BlockSpec((1, Cs_pad), lambda b, t: (0, 0)),        # stem b
                pl.BlockSpec((Cs_pad, F_pad), lambda b, t: (0, 0)),    # pointwise W
                pl.BlockSpec((1, F_pad), lambda b, t: (0, 0)),         # pointwise b
                pl.BlockSpec((F_pad, D_pad), lambda b, t: (0, 0)),     # heads W (f32)
                pl.BlockSpec((1, D_pad), lambda b, t: (0, 0)),         # heads b
            ],
            out_specs=pl.BlockSpec((1, 1, D_pad), lambda b, t: (b, 0, 0)),
            scratch_shapes=[pltpu.VMEM((8, F_pad), jnp.float32)],      # pool acc
        ),
        compiler_params=pltpu.CompilerParams(
            # TODO(synk): on v7x with B==1, split the T reduction across the two
            # TensorCores (core_map + partial pooled sums) instead of relying on
            # the parallel batch axis.
            dimension_semantics=("parallel", "arbitrary"),
            vmem_limit_bytes=32 * 1024 * 1024,
        ),
    )(cols, sw, sb, pw, pb, hw_w, hb)

    out = out.reshape(B, D_pad)
    by, bp = num_bins_yaw, num_bins_pitch
    yaw_head = out[:, :by]
    pitch_head = out[:, by:by + bp]
    yaw_head_reg = out[:, by + bp:by + bp + 1]
    pitch_head_reg = out[:, by + bp + 1:by + bp + 2]
    return yaw_head, pitch_head, yaw_head_reg, pitch_head_reg


# ----------------------------------------------------------------------------
# Parameters: lane-padded matmul weights (bf16 for the backbone, f32 for the
# once-per-batch heads), plus unpadded f32 copies for the pure-JAX reference.
# ----------------------------------------------------------------------------
def init_params(key, c_in, c_stem, n_features, num_bins_yaw, num_bins_pitch):
    ks = jax.random.split(key, 10)
    s = 0.05
    K = 9 * c_in
    D = num_bins_yaw + num_bins_pitch + 2
    Cs_pad = _round_up(c_stem, 128)
    F_pad = _round_up(n_features, 128)
    D_pad = _round_up(D, 128)

    stem_w = s * jax.random.normal(ks[0], (K, c_stem), jnp.float32)
    stem_b = s * jax.random.normal(ks[1], (c_stem,), jnp.float32)
    pw_w = s * jax.random.normal(ks[2], (c_stem, n_features), jnp.float32)
    pw_b = s * jax.random.normal(ks[3], (n_features,), jnp.float32)
    w_yaw = s * jax.random.normal(ks[4], (n_features, num_bins_yaw), jnp.float32)
    w_pitch = s * jax.random.normal(ks[5], (n_features, num_bins_pitch), jnp.float32)
    w_yaw_reg = s * jax.random.normal(ks[6], (n_features, 1), jnp.float32)
    w_pitch_reg = s * jax.random.normal(ks[7], (n_features, 1), jnp.float32)
    b_yaw = s * jax.random.normal(ks[8], (num_bins_yaw,), jnp.float32)
    b_pitch = s * jax.random.normal(ks[9], (num_bins_pitch,), jnp.float32)
    b_yaw_reg = jnp.zeros((1,), jnp.float32)
    b_pitch_reg = jnp.zeros((1,), jnp.float32)
    heads_w = jnp.concatenate([w_yaw, w_pitch, w_yaw_reg, w_pitch_reg], axis=1)
    heads_b = jnp.concatenate([b_yaw, b_pitch, b_yaw_reg, b_pitch_reg], axis=0)

    params = dict(
        stem_w=jnp.pad(stem_w, ((0, 0), (0, Cs_pad - c_stem))).astype(jnp.bfloat16),
        stem_b=jnp.pad(stem_b, (0, Cs_pad - c_stem)).reshape(1, Cs_pad),
        pw_w=jnp.pad(pw_w, ((0, Cs_pad - c_stem),
                            (0, F_pad - n_features))).astype(jnp.bfloat16),
        pw_b=jnp.pad(pw_b, (0, F_pad - n_features)).reshape(1, F_pad),
        # Heads run once per batch -> keep them f32 (regression heads accuracy).
        heads_w=jnp.pad(heads_w, ((0, F_pad - n_features), (0, D_pad - D))),
        heads_b=jnp.pad(heads_b, (0, D_pad - D)).reshape(1, D_pad),
    )
    ref = dict(stem_w=stem_w, stem_b=stem_b, pw_w=pw_w, pw_b=pw_b,
               heads_w=heads_w, heads_b=heads_b)
    return params, ref


def reference_forward(x_nchw, ref, num_bins_yaw, num_bins_pitch):
    x = jnp.transpose(x_nchw, (0, 2, 3, 1)).astype(jnp.float32)
    B, H, W, C = x.shape
    Ho, Wo = H // 2, W // 2
    xp = jnp.pad(x, ((0, 0), (1, 1), (1, 1), (0, 0)))
    patches = [xp[:, ky:ky + 2 * Ho:2, kx:kx + 2 * Wo:2, :]
               for ky in range(3) for kx in range(3)]
    cols = jnp.concatenate(patches, axis=-1).reshape(B * Ho * Wo, 9 * C)
    y = cols @ ref["stem_w"] + ref["stem_b"]
    y = y * jax.nn.sigmoid(y)
    f = y @ ref["pw_w"] + ref["pw_b"]
    f = f * jax.nn.sigmoid(f)
    pooled = f.reshape(B, Ho * Wo, -1).mean(axis=1)
    out = pooled @ ref["heads_w"] + ref["heads_b"]
    by, bp = num_bins_yaw, num_bins_pitch
    return (out[:, :by], out[:, by:by + bp],
            out[:, by + bp:by + bp + 1], out[:, by + bp + 1:by + bp + 2])


if __name__ == "__main__":
    key = jax.random.PRNGKey(0)
    k_x1, k_x2, k_p = jax.random.split(key, 3)

    C_in, C_stem, n_features = 3, 32, 128
    num_bins_yaw, num_bins_pitch = 16, 16
    params, ref_params = init_params(k_p, C_in, C_stem, n_features,
                                     num_bins_yaw, num_bins_pitch)

    # Config 1: default (large) tiling -> single spatial tile, no padding rows.
    B1, H1, W1 = 2, 32, 32
    x1 = jax.random.normal(k_x1, (B1, C_in, H1, W1), jnp.float32)
    outs1 = hydrant_forward(x1, params, num_bins_yaw=num_bins_yaw,
                            num_bins_pitch=num_bins_pitch)
    jax.block_until_ready(outs1)

    # Config 2: forced small tile -> multi-tile spatial reduction + masked last tile
    # (exercises the accumulator and the pl.when-gated mask path).
    B2, H2, W2 = 2, 30, 30
    x2 = jax.random.normal(k_x2, (B2, C_in, H2, W2), jnp.float32)
    outs2 = hydrant_forward(x2, params, num_bins_yaw=num_bins_yaw,
                            num_bins_pitch=num_bins_pitch, tile_m=128)
    jax.block_until_ready(outs2)

    for x, outs in ((x1, outs1), (x2, outs2)):
        yaw, pitch, yaw_reg, pitch_reg = outs
        B = x.shape[0]
        assert yaw.shape == (B, num_bins_yaw)
        assert pitch.shape == (B, num_bins_pitch)
        assert yaw_reg.shape == (B, 1)
        assert pitch_reg.shape == (B, 1)
        refs = reference_forward(x, ref_params, num_bins_yaw, num_bins_pitch)
        for got, want in zip(outs, refs):
            np.testing.assert_allclose(np.asarray(got), np.asarray(want),
                                       atol=2e-2, rtol=2e-2)

    print("KERNEL_OK")
</pallas_src>

<mosaic_0001>
module attributes {stable_mosaic.version = 11 : i64} {
  func.func @_fused_backbone_heads_kernel(%arg0: i32, %arg1: i32, %arg2: memref<1x256x27xbf16, #tpu.memory_space<vmem>>, %arg3: memref<27x128xbf16, #tpu.memory_space<vmem>>, %arg4: memref<1x128xf32, #tpu.memory_space<vmem>>, %arg5: memref<128x128xbf16, #tpu.memory_space<vmem>>, %arg6: memref<1x128xf32, #tpu.memory_space<vmem>>, %arg7: memref<128x128xf32, #tpu.memory_space<vmem>>, %arg8: memref<1x128xf32, #tpu.memory_space<vmem>>, %arg9: memref<1x1x128xf32, #tpu.memory_space<vmem>>, %arg10: memref<8x128xf32, #tpu.memory_space<vmem>>) attributes {dimension_semantics = [#tpu.dimension_semantics<parallel>, #tpu.dimension_semantics<arbitrary>], iteration_bounds = array<i64: 2, 1>, scalar_prefetch = 0 : i64, scratch_operands = 1 : i64, tpu.core_type = #tpu.core_type<tc>, window_params = [{transform_indices = @transform_0, window_bounds = array<i64: 1, 256, 27>}, {pipeline_mode = #tpu.pipeline_mode<synchronous>, transform_indices = @transform_1, window_bounds = array<i64: 27, 128>}, {pipeline_mode = #tpu.pipeline_mode<synchronous>, transform_indices = @transform_2, window_bounds = array<i64: 1, 128>}, {pipeline_mode = #tpu.pipeline_mode<synchronous>, transform_indices = @transform_3, window_bounds = array<i64: 128, 128>}, {pipeline_mode = #tpu.pipeline_mode<synchronous>, transform_indices = @transform_4, window_bounds = array<i64: 1, 128>}, {pipeline_mode = #tpu.pipeline_mode<synchronous>, transform_indices = @transform_5, window_bounds = array<i64: 128, 128>}, {pipeline_mode = #tpu.pipeline_mode<synchronous>, transform_indices = @transform_6, window_bounds = array<i64: 1, 128>}, {transform_indices = @transform_7, window_bounds = array<i64: 1, 1, 128>}]} {
    %c0_i32 = arith.constant 0 : i32
    %0 = arith.cmpi eq, %arg1, %c0_i32 : i32
    %1 = arith.extui %0 : i1 to i32
    %c0_i32_0 = arith.constant 0 : i32
    %2 = arith.cmpi ne, %1, %c0_i32_0 : i32
    scf.if %2 {
      %cst_21 = arith.constant 0.000000e+00 : f32
      %36 = vector.broadcast %cst_21 : f32 to vector<8x128xf32>
      %c0_22 = arith.constant 0 : index
      %c0_23 = arith.constant 0 : index
      %37 = vector.load %arg10[%c0_22, %c0_23] : memref<8x128xf32, #tpu.memory_space<vmem>>, vector<8x128xf32>
      tpu.vector_store %arg10[%c0_22, %c0_23], %36 {strides = array<i32>} : memref<8x128xf32, #tpu.memory_space<vmem>>, vector<8x128xf32>,
    } else {
    }
    %c0 = arith.constant 0 : index
    %c0_1 = arith.constant 0 : index
    %c0_2 = arith.constant 0 : index
    %3 = vector.load %arg2[%c0, %c0_1, %c0_2] : memref<1x256x27xbf16, #tpu.memory_space<vmem>>, vector<1x256x27xbf16>
    %4 = vector.shape_cast %3 : vector<1x256x27xbf16> to vector<256x27xbf16>
    %c0_3 = arith.constant 0 : index
    %c0_4 = arith.constant 0 : index
    %5 = vector.load %arg3[%c0_3, %c0_4] : memref<27x128xbf16, #tpu.memory_space<vmem>>, vector<27x128xbf16>
    %cst = arith.constant dense<0.000000e+00> : vector<256x128xf32>
    %6 = tpu.matmul %4, %5, %cst {dimension_numbers = #tpu.dot_dimension_numbers<[1], [0], [0], [1], [0, 0, 1, 1], [], []>} : vector<256x27xbf16>, vector<27x128xbf16>, vector<256x128xf32> -> vector<256x128xf32>
    %c0_5 = arith.constant 0 : index
    %c0_6 = arith.constant 0 : index
    %7 = vector.load %arg4[%c0_5, %c0_6] : memref<1x128xf32, #tpu.memory_space<vmem>>, vector<1x128xf32>
    %8 = vector.broadcast %7 : vector<1x128xf32> to vector<256x128xf32>
    %9 = arith.addf %6, %8 : vector<256x128xf32>
    %10 = arith.negf %9 : vector<256x128xf32>
    %11 = math.exp %10 : vector<256x128xf32>
    %cst_7 = arith.constant 1.000000e+00 : f32
    %12 = vector.broadcast %cst_7 : f32 to vector<256x128xf32>
    %13 = arith.addf %12, %11 : vector<256x128xf32>
    %14 = arith.divf %12, %13 : vector<256x128xf32>
    %15 = arith.mulf %9, %14 : vector<256x128xf32>
    %16 = arith.truncf %15 : vector<256x128xf32> to vector<256x128xbf16>
    %c0_8 = arith.constant 0 : index
    %c0_9 = arith.constant 0 : index
    %17 = vector.load %arg5[%c0_8, %c0_9] : memref<128x128xbf16, #tpu.memory_space<vmem>>, vector<128x128xbf16>
    %cst_10 = arith.constant dense<0.000000e+00> : vector<256x128xf32>
    %18 = tpu.matmul %16, %17, %cst_10 {dimension_numbers = #tpu.dot_dimension_numbers<[1], [0], [0], [1], [0, 0, 1, 1], [], []>} : vector<256x128xbf16>, vector<128x128xbf16>, vector<256x128xf32> -> vector<256x128xf32>
    %c0_11 = arith.constant 0 : index
    %c0_12 = arith.constant 0 : index
    %19 = vector.load %arg6[%c0_11, %c0_12] : memref<1x128xf32, #tpu.memory_space<vmem>>, vector<1x128xf32>
    %20 = vector.broadcast %19 : vector<1x128xf32> to vector<256x128xf32>
    %21 = arith.addf %18, %20 : vector<256x128xf32>
    %22 = arith.negf %21 : vector<256x128xf32>
    %23 = math.exp %22 : vector<256x128xf32>
    %cst_13 = arith.constant 1.000000e+00 : f32
    %24 = vector.broadcast %cst_13 : f32 to vector<256x128xf32>
    %25 = arith.addf %24, %23 : vector<256x128xf32>
    %26 = arith.divf %24, %25 : vector<256x128xf32>
    %27 = arith.mulf %21, %26 : vector<256x128xf32>
    %c0_14 = arith.constant 0 : index
    %c0_15 = arith.constant 0 : index
    %28 = vector.load %arg10[%c0_14, %c0_15] : memref<8x128xf32, #tpu.memory_space<vmem>>, vector<8x128xf32>
    %29 = vector.shape_cast %27 : vector<256x128xf32> to vector<32x8x128xf32>
    %cst_16 = arith.constant dense<0.000000e+00> : vector<8x128xf32>
    %30 = vector.multi_reduction <add>, %29, %cst_16 [0] : vector<32x8x128xf32> to vector<8x128xf32>
    %31 = arith.addf %28, %30 : vector<8x128xf32>
    %c0_17 = arith.constant 0 : index
    %c0_18 = arith.constant 0 : index
    %32 = vector.load %arg10[%c0_17, %c0_18] : memref<8x128xf32, #tpu.memory_space<vmem>>, vector<8x128xf32>
    tpu.vector_store %arg10[%c0_17, %c0_18], %31 {strides = array<i32>} : memref<8x128xf32, #tpu.memory_space<vmem>>, vector<8x128xf32>,
    %c0_i32_19 = arith.constant 0 : i32
    %33 = arith.cmpi eq, %arg1, %c0_i32_19 : i32
    %34 = arith.extui %33 : i1 to i32
    %c0_i32_20 = arith.constant 0 : i32
    %35 = arith.cmpi ne, %34, %c0_i32_20 : i32
    scf.if %35 {
      %c0_21 = arith.constant 0 : index
      %c0_22 = arith.constant 0 : index
      %36 = vector.load %arg10[%c0_21, %c0_22] : memref<8x128xf32, #tpu.memory_space<vmem>>, vector<8x128xf32>
      %cst_23 = arith.constant dense<0.000000e+00> : vector<128xf32>
      %37 = vector.multi_reduction <add>, %36, %cst_23 [0] : vector<8x128xf32> to vector<128xf32>
      %38 = vector.shape_cast %37 : vector<128xf32> to vector<1x128xf32>
      %cst_24 = arith.constant 3.906250e-03 : f32
      %39 = vector.broadcast %cst_24 : f32 to vector<1x128xf32>
      %40 = arith.mulf %38, %39 : vector<1x128xf32>
      %c0_25 = arith.constant 0 : index
      %c0_26 = arith.constant 0 : index
      %41 = vector.load %arg7[%c0_25, %c0_26] : memref<128x128xf32, #tpu.memory_space<vmem>>, vector<128x128xf32>
      %cst_27 = arith.constant dense<0.000000e+00> : vector<1x128xf32>
      %42 = tpu.matmul %40, %41, %cst_27 {dimension_numbers = #tpu.dot_dimension_numbers<[1], [0], [0], [1], [0, 0, 1, 1], [], []>} : vector<1x128xf32>, vector<128x128xf32>, vector<1x128xf32> -> vector<1x128xf32>
      %c0_28 = arith.constant 0 : index
      %c0_29 = arith.constant 0 : index
      %43 = vector.load %arg8[%c0_28, %c0_29] : memref<1x128xf32, #tpu.memory_space<vmem>>, vector<1x128xf32>
      %44 = arith.addf %42, %43 : vector<1x128xf32>
      %45 = vector.shape_cast %44 : vector<1x128xf32> to vector<1x1x128xf32>
      %c0_30 = arith.constant 0 : index
      %c0_31 = arith.constant 0 : index
      %c0_32 = arith.constant 0 : index
      %46 = vector.load %arg9[%c0_30, %c0_31, %c0_32] : memref<1x1x128xf32, #tpu.memory_space<vmem>>, vector<1x1x128xf32>
      tpu.vector_store %arg9[%c0_30, %c0_31, %c0_32], %45 {strides = array<i32>} : memref<1x1x128xf32, #tpu.memory_space<vmem>>, vector<1x1x128xf32>,
    } else {
    }
    return
  }
  func.func @transform_0(%arg0: i32, %arg1: i32) -> (i32, i32, i32) {
    %c0_i32 = arith.constant 0 : i32
    %c0_i32_0 = arith.constant 0 : i32
    return %arg0, %arg1, %c0_i32 : i32, i32, i32
  }
  func.func @transform_1(%arg0: i32, %arg1: i32) -> (i32, i32) {
    %c0_i32 = arith.constant 0 : i32
    %c0_i32_0 = arith.constant 0 : i32
    %c0_i32_1 = arith.constant 0 : i32
    return %c0_i32, %c0_i32_0 : i32, i32
  }
  func.func @transform_2(%arg0: i32, %arg1: i32) -> (i32, i32) {
    %c0_i32 = arith.constant 0 : i32
    %c0_i32_0 = arith.constant 0 : i32
    %c0_i32_1 = arith.constant 0 : i32
    return %c0_i32, %c0_i32_0 : i32, i32
  }
  func.func @transform_3(%arg0: i32, %arg1: i32) -> (i32, i32) {
    %c0_i32 = arith.constant 0 : i32
    %c0_i32_0 = arith.constant 0 : i32
    %c0_i32_1 = arith.constant 0 : i32
    return %c0_i32, %c0_i32_0 : i32, i32
  }
  func.func @transform_4(%arg0: i32, %arg1: i32) -> (i32, i32) {
    %c0_i32 = arith.constant 0 : i32
    %c0_i32_0 = arith.constant 0 : i32
    %c0_i32_1 = arith.constant 0 : i32
    return %c0_i32, %c0_i32_0 : i32, i32
  }
  func.func @transform_5(%arg0: i32, %arg1: i32) -> (i32, i32) {
    %c0_i32 = arith.constant 0 : i32
    %c0_i32_0 = arith.constant 0 : i32
    %c0_i32_1 = arith.constant 0 : i32
    return %c0_i32, %c0_i32_0 : i32, i32
  }
  func.func @transform_6(%arg0: i32, %arg1: i32) -> (i32, i32) {
    %c0_i32 = arith.constant 0 : i32
    %c0_i32_0 = arith.constant 0 : i32
    %c0_i32_1 = arith.constant 0 : i32
    return %c0_i32, %c0_i32_0 : i32, i32
  }
  func.func @transform_7(%arg0: i32, %arg1: i32) -> (i32, i32, i32) {
    %c0_i32 = arith.constant 0 : i32
    %c0_i32_0 = arith.constant 0 : i32
    %c0_i32_1 = arith.constant 0 : i32
    return %arg0, %c0_i32, %c0_i32_0 : i32, i32, i32
  }
}

</mosaic_0001>

<bundles_post_ra>
// kernel: hydrant_forward.1
= control target key start
LH: loop header
LB: loop body
LE: loop exit
PB: predicated region body
PF: predicated region fallthrough
CT: control target
= control target key end

     0   :  { %s2248_s24 = smov 0   ;;  %s2250_s25 = smov 0   ;;  %s2730_s0 = inlined_call_operand.vmem [shape: bf16[2,256,27], index: 0, kind: input, shape index: {}]   ;;  %s2731_s1 = inlined_call_operand.vmem [shape: bf16[27,128], index: 1, kind: input, shape index: {}]   ;;  %s2732_s2 = inlined_call_operand.vmem [shape: f32[1,128], index: 2, kind: input, shape index: {}]   ;;  %s2733_s3 = inlined_call_operand.vmem [shape: bf16[128,128], index: 3, kind: input, shape index: {}]   ;;  %s2734_s4 = inlined_call_operand.vmem [shape: f32[1,128], index: 4, kind: input, shape index: {}]   ;;  %s2735_s5 = inlined_call_operand.vmem [shape: f32[128,128], index: 5, kind: input, shape index: {}]   ;;  %s2736_s6 = inlined_call_operand.vmem [shape: f32[1,128], index: 6, kind: input, shape index: {}]   ;;  %s2737_s7 = inlined_call_operand.vmem [shape: f32[2,1,128], index: 7, kind: output, shape index: {}]  }
   0x1   :  { %s2252_s26 = smov 0  }
   0x2 LB: > { %s29_s27 = sadd.s32 1, %s2198_s25  ;;  %p1554_p0 = scmp.ge.s32.totalorder %s2202_s26, 1  ;;  %s2202_s26 = sphi %s2252_s26, %s17_s26   ;;  %s2198_s25 = sphi %s2250_s25, %s2739_s25   ;;  %s2194_s24 = sphi %s2248_s24, %s2738_s24  }
   0x3   : > { %p31_p1 = scmp.ge.s32.totalorder %s29_s27, 2  ;;  %p256_p2 = scmp.lt.s32.totalorder %s2202_s26, 3 }
   0x5   : > { %s2741_s27 = smov (%p31_p1, %s29_s27), 0  ;;  %p257_p3 = pnand %p1554_p0, %p256_p2 }
   0x6   : > { %v1898_v0 = vld [vmem:[%s2731_s1] sm:$0xff] (!%p257_p3)   ;;  %vm492_vm0 = vcmask (!%p257_p3), 1044480   ;;  %v1899_v1 = vld [vmem:[%s2731_s1 + $0x8] sm:$0x3f] (!%p257_p3)   ;;  %vm493_vm1 = vcmask (!%p257_p3), 1045504   ;;  %p291_p4 = scmp.lt.s32.totalorder (!%p257_p3), %s2194_s24, 1 }
   0x7   : > { %260 = sbr.rel (%p257_p3) target bundleno = 810 (0x32a), region = 48  ;;  %1727 = vmatprep.subr.bf16.mxu0 (!%p257_p3), %v1898_v0  ;;  %v2204_v2 = vmov (!%p257_p3), 65535   ;;  %vm443_vm2 = vcmask (!%p257_p3), 220160   ;;  %v1916_v22 = vld [vmem:[%s2733_s3] sm:$0xff] (!%p257_p3)   ;;  %v1917_v23 = vld [vmem:[%s2733_s3 + $0x8] sm:$0xff] (!%p257_p3)   ;;  %v1918_v24 = vld [vmem:[%s2733_s3 + $0x10] sm:$0xff] (!%p257_p3)  }
   0x8   : > { %1728 = vmatpush3.bf16.msra.mxu0 (!%p257_p3), %v1898_v0  ;;  %v494_v3 = vsel (!%p257_p3), %vm492_vm0, 4294967295, %v2204_v2  ;;  %1763 = vmatprep.subr.bf16.mxu1 (!%p257_p3), %v1916_v22  ;;  %v1919_v25 = vld [vmem:[%s2733_s3 + $0x18] sm:$0xff] (!%p257_p3)   ;;  %v1920_v26 = vld [vmem:[%s2733_s3 + $0x20] sm:$0xff] (!%p257_p3)   ;;  %v1921_v27 = vld [vmem:[%s2733_s3 + $0x28] sm:$0xff] (!%p257_p3)   ;;  %vm2206_vm3 = vmmov (!%p257_p3), 0  }
   0x9   : > { %v495_v4 = vsel (!%p257_p3), %vm493_vm1, %v494_v3, 0  ;;  %1764 = vmatpush3.bf16.msra.mxu1 (!%p257_p3), %v1916_v22  ;;  %v1922_v28 = vld [vmem:[%s2733_s3 + $0x30] sm:$0xff] (!%p257_p3)   ;;  %v1923_v29 = vld [vmem:[%s2733_s3 + $0x38] sm:$0xff] (!%p257_p3)   ;;  %v2339_v30 = vld [vmem:[%s2732_s2] ss:$0 sm:$0xff] (!%p257_p3) }
   0xa   : > { %v497_v5 = vand.u32 (!%p257_p3), %v1899_v1, %v495_v4  ;;  %1765 = vmatprep.subr.bf16.mxu1 (!%p257_p3), %v1917_v23 }
   0xc   : > { %1729 = vmatprep.subr.bf16.mxu0 (!%p257_p3), %v497_v5 }
   0xd   : > { %1730 = vmatpush3.bf16.msra.mxu0 (!%p257_p3), %v497_v5  ;;  %1766 = vmatpush3.bf16.msra.mxu1 (!%p257_p3), %v1917_v23 }
   0xe   : > { %s2743_s24 = smov (!%p291_p4, %s2194_s24), 1  ;;  %1767 = vmatprep.subr.bf16.mxu1 %v1918_v24 }
   0xf   : > { %s1667_s9 = sshll.u32 %s2743_s24, 7 }
  0x10   : > { %s2278_s12 = scalar_lea.vmem %s2730_s0, %s1667_s9 }
  0x11   : > { %v1900_v6 = vld [vmem:[%s2278_s12] sm:$0xff]   ;;  %v1901_v7 = vld [vmem:[%s2278_s12 + $0x8] sm:$0xff]   ;;  %v1902_v8 = vld [vmem:[%s2278_s12 + $0x10] sm:$0xff]   ;;  %1768 = vmatpush3.bf16.msra.mxu1 %v1918_v24 }
  0x12   : > { %1731 = vmatprep.mubr.msk.bf16.mxu0 %vm443_vm2, %v1900_v6  ;;  %v1903_v9 = vld [vmem:[%s2278_s12 + $0x18] sm:$0xff]   ;;  %v1904_v10 = vld [vmem:[%s2278_s12 + $0x20] sm:$0xff]   ;;  %v1905_v11 = vld [vmem:[%s2278_s12 + $0x28] sm:$0xff]   ;;  %1769 = vmatprep.subr.bf16.mxu1 %v1919_v25 }
  0x13   : > { %1732 = vmatmul.mubr.msk.bf16.vlgmr.msra.gmra.mrb[0].mxu0 %vm443_vm2, %v1901_v7  ;;  %v1906_v12 = vld [vmem:[%s2278_s12 + $0x30] sm:$0xff]   ;;  %v1907_v13 = vld [vmem:[%s2278_s12 + $0x38] sm:$0xff]   ;;  %v1908_v14 = vld [vmem:[%s2278_s12 + $0x40] sm:$0xff]  }
  0x14   : > { %1735 = vmatprep.mubr.msk.bf16.mxu0 %vm443_vm2, %v1902_v8  ;;  %v1909_v15 = vld [vmem:[%s2278_s12 + $0x48] sm:$0xff]   ;;  %v1910_v16 = vld [vmem:[%s2278_s12 + $0x50] sm:$0xff]   ;;  %v1911_v17 = vld [vmem:[%s2278_s12 + $0x58] sm:$0xff]  }
  0x15   : > { %v1912_v18 = vld [vmem:[%s2278_s12 + $0x60] sm:$0xff]   ;;  %v1913_v19 = vld [vmem:[%s2278_s12 + $0x68] sm:$0xff]   ;;  %v1914_v20 = vld [vmem:[%s2278_s12 + $0x70] sm:$0xff]   ;;  %1770 = vmatpush3.bf16.msra.mxu1 %v1919_v25 }
  0x16   : > { %v1915_v21 = vld [vmem:[%s2278_s12 + $0x78] sm:$0xff]   ;;  %1771 = vmatprep.subr.bf16.mxu1 %v1920_v26  ;;  %s302_s12 = scalar_lea.vmem %s2737_s7, %s2743_s24 }
  0x19   : > { %1772 = vmatpush3.bf16.msra.mxu1 %v1920_v26 }
  0x1a   : > { %1773 = vmatprep.subr.bf16.mxu1 %v1921_v27 }
  0x1b   : > { %1736 = vmatmul.mubr.msk.bf16.gmra.mrb[4].mxu0 %vm443_vm2, %v1903_v9 }
  0x1c   : > { %1739 = vmatprep.mubr.msk.bf16.mxu0 %vm443_vm2, %v1904_v10 }
  0x1d   : > { %1774 = vmatpush3.bf16.msra.mxu1 %v1921_v27 }
  0x1e   : > { %1775 = vmatprep.subr.bf16.mxu1 %v1922_v28 }
  0x21   : > { %1776 = vmatpush3.bf16.msra.mxu1 %v1922_v28 }
  0x22   : > { %1777 = vmatprep.subr.bf16.mxu1 %v1923_v29 }
  0x23   : > { %1740 = vmatmul.mubr.msk.bf16.gmra.mrb[8].mxu0 %vm443_vm2, %v1905_v11 }
  0x24   : > { %1743 = vmatprep.mubr.msk.bf16.mxu0 %vm443_vm2, %v1906_v12 }
  0x25   : > { %1778 = vmatpush3.bf16.msra.mxu1 %v1923_v29 }
  0x2b   : > { %1744 = vmatmul.mubr.msk.bf16.gmra.mrb[12].mxu0 %vm443_vm2, %v1907_v13 }
  0x2c   : > { %1747 = vmatprep.mubr.msk.bf16.mxu0 %vm443_vm2, %v1908_v14 }
  0x33   : > { %1748 = vmatmul.mubr.msk.bf16.gmra.mrb[16].mxu0 %vm443_vm2, %v1909_v15 }
  0x34   : > { %1751 = vmatprep.mubr.msk.bf16.mxu0 %vm443_vm2, %v1910_v16 }
  0x3b   : > { %1752 = vmatmul.mubr.msk.bf16.gmra.mrb[20].mxu0 %vm443_vm2, %v1911_v17 }
  0x3c   : > { %1755 = vmatprep.mubr.msk.bf16.mxu0 %vm443_vm2, %v1912_v18 }
  0x43   : > { %1756 = vmatmul.mubr.msk.bf16.gmra.mrb[24].mxu0 %vm443_vm2, %v1913_v19 }
  0x44   : > { %1759 = vmatprep.mubr.msk.bf16.mxu0 %vm443_vm2, %v1914_v20 }
  0x4b   : > { %1760 = vmatmul.mubr.msk.bf16.gmra.mrb[28].mxu0 %vm443_vm2, %v1915_v21 }
  0xe6   : > { %v1733_v31 = vpop.f32.mrb[0].mxu0 }
  0xe7   : > { %v2342_v32 = vadd.f32 %v1733_v31, %v2339_v30  ;;  %v533_v33 = vpop.f32.mrb[1].mxu0 }
  0xe8   : > { %v2345_v34 = vadd.f32 %v2339_v30, %v533_v33  ;;  %v1734_v35 = vpop.f32.mrb[2].mxu0 }
  0xe9   : > { %v1594_v36 = vmul.f32 -1.442695, %v2342_v32  ;;  %v2349_v37 = vadd.f32 %v1734_v35, %v2339_v30  ;;  %v536_v38 = vpop.f32.mrb[3].mxu0 }
  0xea   : > { %v1592_v39 = vmul.f32 -1.442695, %v2345_v34  ;;  %v2353_v40 = vadd.f32 %v2339_v30, %v536_v38 }
  0xeb   : > { %1924 = vpow2.f32 %v1594_v36  ;;  %v1595_v41 = vmul.f32 -1.442695, %v2349_v37 }
  0xec   : > { %1926 = vpow2.f32 %v1592_v39  ;;  %v1593_v42 = vmul.f32 -1.442695, %v2353_v40 }
  0xed   : > { %1928 = vpow2.f32 %v1595_v41 }
  0xee   : > { %1930 = vpow2.f32 %v1593_v42  ;;  %v1737_v43 = vpop.f32.mrb[4].mxu0 }
  0xef   : > { %v2358_v44 = vadd.f32 %v1737_v43, %v2339_v30  ;;  %v549_v45 = vpop.f32.mrb[5].mxu0 }
  0xf0   : > { %v2361_v46 = vadd.f32 %v2339_v30, %v549_v45  ;;  %v1738_v47 = vpop.f32.mrb[6].mxu0 }
  0xf1   : > { %v1598_v48 = vmul.f32 -1.442695, %v2358_v44  ;;  %v2365_v49 = vadd.f32 %v1738_v47, %v2339_v30  ;;  %v552_v50 = vpop.f32.mrb[7].mxu0 }
  0xf2   : > { %v1596_v51 = vmul.f32 -1.442695, %v2361_v46  ;;  %v2369_v52 = vadd.f32 %v2339_v30, %v552_v50 }
  0xf3   : > { %1932 = vpow2.f32 %v1598_v48  ;;  %v1599_v53 = vmul.f32 -1.442695, %v2365_v49 }
  0xf4   : > { %1934 = vpow2.f32 %v1596_v51  ;;  %v1597_v54 = vmul.f32 -1.442695, %v2369_v52 }
  0xf5   : > { %v1925_v55 = vpop.eup %1924  ;;  %1936 = vpow2.f32 %v1599_v53 }
  0xf6   : > { %v1927_v56 = vpop.eup %1926  ;;  %v758_v57 = vadd.f32 1.0, %v1925_v55  ;;  %1938 = vpow2.f32 %v1597_v54  ;;  %v1741_v58 = vpop.f32.mrb[8].mxu0 }
  0xf7   : > { %v1929_v59 = vpop.eup %1928  ;;  %v756_v60 = vadd.f32 1.0, %v1927_v56  ;;  %v2374_v61 = vadd.f32 %v1741_v58, %v2339_v30  ;;  %v565_v62 = vpop.f32.mrb[9].mxu0 }
  0xf8   : > { %v1931_v63 = vpop.eup %1930  ;;  %1940 = vrcp.f32 %v758_v57  ;;  %v759_v0 = vadd.f32 1.0, %v1929_v59  ;;  %v2377_v1 = vadd.f32 %v2339_v30, %v565_v62  ;;  %v1742_v2 = vpop.f32.mrb[10].mxu0 }
  0xf9   : > { %1942 = vrcp.f32 %v756_v60  ;;  %v757_v3 = vadd.f32 1.0, %v1931_v63  ;;  %v1602_v4 = vmul.f32 -1.442695, %v2374_v61  ;;  %v2381_v5 = vadd.f32 %v1742_v2, %v2339_v30  ;;  %v568_v6 = vpop.f32.mrb[11].mxu0 }
  0xfa   : > { %1944 = vrcp.f32 %v759_v0  ;;  %v1600_v7 = vmul.f32 -1.442695, %v2377_v1  ;;  %v2385_v8 = vadd.f32 %v2339_v30, %v568_v6 }
  0xfb   : > { %1946 = vrcp.f32 %v757_v3  ;;  %v1603_v9 = vmul.f32 -1.442695, %v2381_v5 }
  0xfc   : > { %1948 = vpow2.f32 %v1602_v4  ;;  %v1601_v10 = vmul.f32 -1.442695, %v2385_v8 }
  0xfd   : > { %v1933_v11 = vpop.eup %1932  ;;  %1950 = vpow2.f32 %v1600_v7 }
  0xfe   : > { %v1935_v12 = vpop.eup %1934  ;;  %v762_v13 = vadd.f32 1.0, %v1933_v11  ;;  %1952 = vpow2.f32 %v1603_v9  ;;  %v1745_v14 = vpop.f32.mrb[12].mxu0 }
  0xff   : > { %v1937_v15 = vpop.eup %1936  ;;  %v760_v16 = vadd.f32 1.0, %v1935_v12  ;;  %1954 = vpow2.f32 %v1601_v10  ;;  %v2390_v17 = vadd.f32 %v1745_v14, %v2339_v30  ;;  %v581_v18 = vpop.f32.mrb[13].mxu0 }
 0x100   : > { %v1939_v19 = vpop.eup %1938  ;;  %1956 = vrcp.f32 %v762_v13  ;;  %v763_v20 = vadd.f32 1.0, %v1937_v15  ;;  %v2393_v21 = vadd.f32 %v2339_v30, %v581_v18  ;;  %v1746_v22 = vpop.f32.mrb[14].mxu0 }
 0x101   : > { %1958 = vrcp.f32 %v760_v16  ;;  %v761_v23 = vadd.f32 1.0, %v1939_v19  ;;  %v1606_v24 = vmul.f32 -1.442695, %v2390_v17  ;;  %v2397_v25 = vadd.f32 %v1746_v22, %v2339_v30  ;;  %v584_v26 = vpop.f32.mrb[15].mxu0 }
 0x102   : > { %v1941_v27 = vpop.eup %1940  ;;  %1960 = vrcp.f32 %v763_v20  ;;  %v1604_v28 = vmul.f32 -1.442695, %v2393_v21  ;;  %v2401_v29 = vadd.f32 %v2339_v30, %v584_v26 }
 0x103   : > { %v1943_v31 = vpop.eup %1942  ;;  %1962 = vrcp.f32 %v761_v23  ;;  %v1607_v33 = vmul.f32 -1.442695, %v2397_v25  ;;  %v854_v39 = vmul.f32 %v1941_v27, %v2342_v32 }
 0x104   : > { %v1945_v35 = vpop.eup %1944  ;;  %1964 = vpow2.f32 %v1606_v24  ;;  %v1605_v36 = vmul.f32 -1.442695, %v2401_v29  ;;  %v852_v45 = vmul.f32 %v1943_v31, %v2345_v34 }
 0x105   : > { %v1947_v38 = vpop.eup %1946  ;;  %v855_v41 = vmul.f32 %v1945_v35, %v2349_v37  ;;  %1966 = vpow2.f32 %v1604_v28 }
 0x106   : > { %v1949_v42 = vpop.eup %1948  ;;  %1968 = vpow2.f32 %v1607_v33  ;;  %v1749_v43 = vpop.f32.mrb[16].mxu0  ;;  %v853_v47 = vmul.f32 %v1947_v38, %v2353_v40 }
 0x107   : > { %v1951_v48 = vpop.eup %1950  ;;  %v766_v50 = vadd.f32 1.0, %v1949_v42  ;;  %1970 = vpow2.f32 %v1605_v36  ;;  %v2410_v51 = vadd.f32 %v1749_v43, %v2339_v30  ;;  %v597_v53 = vpop.f32.mrb[17].mxu0  ;;  %v885_v54 = vpack.c.bf16 %v855_v41, %v854_v39 }
 0x108   : > { %v1953_v55 = vpop.eup %1952  ;;  %v764_v32 = vadd.f32 1.0, %v1951_v48  ;;  %v2413_v37 = vadd.f32 %v2339_v30, %v597_v53  ;;  %v1750_v56 = vpop.f32.mrb[18].mxu0  ;;  %v884_v57 = vpack.c.bf16 %v853_v47, %v852_v45 }
 0x109   : > { %v1955_v58 = vpop.eup %1954  ;;  %1972 = vrcp.f32 %v766_v50  ;;  %v767_v34 = vadd.f32 1.0, %v1953_v55  ;;  %v1610_v40 = vmul.f32 -1.442695, %v2410_v51  ;;  %v2417_v59 = vadd.f32 %v1750_v56, %v2339_v30  ;;  %v600_v60 = vpop.f32.mrb[19].mxu0 }
 0x10a   : > { %v1957_v62 = vpop.eup %1956  ;;  %1974 = vrcp.f32 %v764_v32  ;;  %v765_v63 = vadd.f32 1.0, %v1955_v58  ;;  %v1608_v0 = vmul.f32 -1.442695, %v2413_v37  ;;  %v2421_v2 = vadd.f32 %v2339_v30, %v600_v60  ;;  %1779 = vmatprep.mubr.bf16.mxu1 %v884_v57 }
 0x10b   : > { %v1959_v3 = vpop.eup %1958  ;;  %1976 = vrcp.f32 %v767_v34  ;;  %v1611_v4 = vmul.f32 -1.442695, %v2417_v59  ;;  %1780 = vmatmul.mubr.bf16.vlgmr.msra.gmra.mrb[0].mxu1 %v885_v54  ;;  %v858_v10 = vmul.f32 %v1957_v62, %v2358_v44 }
 0x10c   : > { %v1961_v6 = vpop.eup %1960  ;;  %1978 = vrcp.f32 %v765_v63  ;;  %v1609_v7 = vmul.f32 -1.442695, %v2421_v2  ;;  %v856_v13 = vmul.f32 %v1959_v3, %v2361_v46 }
 0x10d   : > { %v1963_v9 = vpop.eup %1962  ;;  %v859_v11 = vmul.f32 %v1961_v6, %v2365_v49  ;;  %1980 = vpow2.f32 %v1610_v40 }
 0x10e   : > { %v1965_v12 = vpop.eup %1964  ;;  %v857_v14 = vmul.f32 %v1963_v9, %v2369_v52  ;;  %1982 = vpow2.f32 %v1608_v0  ;;  %v1753_v15 = vpop.f32.mrb[20].mxu0 }
 0x10f   : > { %v1967_v16 = vpop.eup %1966  ;;  %v770_v18 = vadd.f32 1.0, %v1965_v12  ;;  %1984 = vpow2.f32 %v1611_v4  ;;  %v2430_v19 = vadd.f32 %v1753_v15, %v2339_v30  ;;  %v613_v20 = vpop.f32.mrb[21].mxu0  ;;  %v887_v22 = vpack.c.bf16 %v859_v11, %v858_v10 }
 0x110   : > { %v1969_v23 = vpop.eup %1968  ;;  %v768_v44 = vadd.f32 1.0, %v1967_v16  ;;  %1986 = vpow2.f32 %v1609_v7  ;;  %v2433_v49 = vadd.f32 %v2339_v30, %v613_v20  ;;  %v1754_v24 = vpop.f32.mrb[22].mxu0  ;;  %v886_v46 = vpack.c.bf16 %v857_v14, %v856_v13 }
 0x111   : > { %v1971_v26 = vpop.eup %1970  ;;  %1988 = vrcp.f32 %v770_v18  ;;  %v771_v52 = vadd.f32 1.0, %v1969_v23  ;;  %v1614_v27 = vmul.f32 -1.442695, %v2430_v19  ;;  %v2437_v28 = vadd.f32 %v1754_v24, %v2339_v30  ;;  %v616_v31 = vpop.f32.mrb[23].mxu0 }
 0x112   : > { %1990 = vrcp.f32 %v768_v44  ;;  %v769_v33 = vadd.f32 1.0, %v1971_v26  ;;  %v1612_v35 = vmul.f32 -1.442695, %v2433_v49  ;;  %v2441_v36 = vadd.f32 %v2339_v30, %v616_v31  ;;  %1783 = vmatprep.mubr.bf16.mxu1 %v886_v46 }
 0x113   : > { %v1973_v38 = vpop.eup %1972  ;;  %1992 = vrcp.f32 %v771_v52  ;;  %v1615_v39 = vmul.f32 -1.442695, %v2437_v28  ;;  %1784 = vmatmul.mubr.bf16.gmra.mrb[4].mxu1 %v887_v22 }
 0x114   : > { %v1975_v41 = vpop.eup %1974  ;;  %1994 = vrcp.f32 %v769_v33  ;;  %v1613_v42 = vmul.f32 -1.442695, %v2441_v36  ;;  %v862_v47 = vmul.f32 %v1973_v38, %v2374_v61 }
 0x115   : > { %v1977_v43 = vpop.eup %1976  ;;  %1996 = vpow2.f32 %v1614_v27  ;;  %v860_v54 = vmul.f32 %v1975_v41, %v2377_v1 }
 0x116   : > { %v1979_v45 = vpop.eup %1978  ;;  %v863_v48 = vmul.f32 %v1977_v43, %v2381_v5  ;;  %1998 = vpow2.f32 %v1612_v35  ;;  %v1757_v50 = vpop.f32.mrb[24].mxu0 }
 0x117   : > { %v1981_v53 = vpop.eup %1980  ;;  %v861_v55 = vmul.f32 %v1979_v45, %v2385_v8  ;;  %2000 = vpow2.f32 %v1615_v39  ;;  %v2450_v32 = vadd.f32 %v1757_v50, %v2339_v30  ;;  %v629_v56 = vpop.f32.mrb[25].mxu0 }
 0x118   : > { %v1983_v57 = vpop.eup %1982  ;;  %v774_v58 = vadd.f32 1.0, %v1981_v53  ;;  %2002 = vpow2.f32 %v1613_v42  ;;  %v2453_v34 = vadd.f32 %v2339_v30, %v629_v56  ;;  %v1758_v61 = vpop.f32.mrb[26].mxu0  ;;  %v889_v5 = vpack.c.bf16 %v863_v48, %v862_v47 }
 0x119   : > { %v1985_v40 = vpop.eup %1984  ;;  %v772_v60 = vadd.f32 1.0, %v1983_v57  ;;  %v2456_v62 = vadd.f32 %v1758_v61, %v2339_v30  ;;  %v632_v1 = vpop.f32.mrb[27].mxu0  ;;  %v888_v8 = vpack.c.bf16 %v861_v55, %v860_v54  ;;  %v1618_v3 = vmul.f32 -1.442695, %v2450_v32 }
 0x11a   : > { %v1987_v63 = vpop.eup %1986  ;;  %2004 = vrcp.f32 %v774_v58  ;;  %v775_v0 = vadd.f32 1.0, %v1985_v40  ;;  %v2460_v4 = vadd.f32 %v2339_v30, %v632_v1  ;;  %v1616_v9 = vmul.f32 -1.442695, %v2453_v34 }
 0x11b   : > { %v1989_v6 = vpop.eup %1988  ;;  %2006 = vrcp.f32 %v772_v60  ;;  %v773_v7 = vadd.f32 1.0, %v1987_v63  ;;  %1787 = vmatprep.mubr.bf16.mxu1 %v888_v8  ;;  %v1619_v11 = vmul.f32 -1.442695, %v2456_v62 }
 0x11c   : > { %v1991_v10 = vpop.eup %1990  ;;  %2008 = vrcp.f32 %v775_v0  ;;  %1788 = vmatmul.mubr.bf16.gmra.mrb[8].mxu1 %v889_v5  ;;  %v1617_v13 = vmul.f32 -1.442695, %v2460_v4  ;;  %v866_v15 = vmul.f32 %v1989_v6, %v2390_v17 }
 0x11d   : > { %v1993_v12 = vpop.eup %1992  ;;  %2010 = vrcp.f32 %v773_v7 }
 0x11e   : > { %v1995_v14 = vpop.eup %1994  ;;  %v867_v16 = vmul.f32 %v1993_v12, %v2397_v25  ;;  %2012 = vpow2.f32 %v1618_v3  ;;  %v1761_v18 = vpop.f32.mrb[28].mxu0  ;;  %v864_v25 = vmul.f32 %v1991_v10, %v2393_v21 }
 0x11f   : > { %v1997_v20 = vpop.eup %1996  ;;  %v865_v22 = vmul.f32 %v1995_v14, %v2401_v29  ;;  %2014 = vpow2.f32 %v1616_v9  ;;  %v2469_v23 = vadd.f32 %v1761_v18, %v2339_v30  ;;  %v645_v44 = vpop.f32.mrb[29].mxu0 }
 0x120   : > { %v1999_v24 = vpop.eup %1998  ;;  %v778_v46 = vadd.f32 1.0, %v1997_v20  ;;  %2016 = vpow2.f32 %v1619_v11  ;;  %v2472_v26 = vadd.f32 %v2339_v30, %v645_v44  ;;  %v1762_v52 = vpop.f32.mrb[30].mxu0  ;;  %v891_v17 = vpack.c.bf16 %v867_v16, %v866_v15 }
 0x121   : > { %v2001_v27 = vpop.eup %2000  ;;  %v776_v31 = vadd.f32 1.0, %v1999_v24  ;;  %2018 = vpow2.f32 %v1617_v13  ;;  %v2476_v29 = vadd.f32 %v1762_v52, %v2339_v30  ;;  %v648_v33 = vpop.f32.mrb[31].mxu0  ;;  %v1622_v39 = vmul.f32 -1.442695, %v2469_v23 }
 0x122   : > { %v2003_v35 = vpop.eup %2002  ;;  %2020 = vrcp.f32 %v778_v46  ;;  %v779_v38 = vadd.f32 1.0, %v2001_v27  ;;  %v2480_v41 = vadd.f32 %v2339_v30, %v648_v33  ;;  %v1620_v43 = vmul.f32 -1.442695, %v2472_v26 }
 0x123   : > { %2022 = vrcp.f32 %v776_v31  ;;  %v777_v42 = vadd.f32 1.0, %v2003_v35  ;;  %v890_v45 = vpack.c.bf16 %v865_v22, %v864_v25  ;;  %v1623_v47 = vmul.f32 -1.442695, %v2476_v29 }
 0x124   : > { %v2005_v21 = vpop.eup %2004  ;;  %2024 = vrcp.f32 %v779_v38  ;;  %v1621_v50 = vmul.f32 -1.442695, %v2480_v41 }
 0x125   : > { %v2007_v48 = vpop.eup %2006  ;;  %2026 = vrcp.f32 %v777_v42  ;;  %1791 = vmatprep.mubr.bf16.mxu1 %v890_v45  ;;  %v870_v30 = vmul.f32 %v2005_v21, %v2410_v51  ;;  %v1402_v45 = vld [vmem:[%s2735_s5 + $0x8] sm:$0xff]  ;;  %v2205_v21 = vmov 0.0|0.0  }
 0x126   : > { %v2009_v53 = vpop.eup %2008  ;;  %2028 = vpow2.f32 %v1622_v39  ;;  %1792 = vmatmul.mubr.bf16.gmra.mrb[12].mxu1 %v891_v17  ;;  %v868_v57 = vmul.f32 %v2007_v48, %v2413_v37  ;;  %1846 = vmatprep.subr.bf16.mxu0 %v2205_v21  ;;  %v1406_v48 = vld [vmem:[%s2735_s5 + $0x28] sm:$0xff] }
 0x127   : > { %v2011_v54 = vpop.eup %2010  ;;  %v871_v55 = vmul.f32 %v2009_v53, %v2417_v59  ;;  %2030 = vpow2.f32 %v1620_v43  ;;  %v1407_v53 = vld [vmem:[%s2735_s5 + $0x30] sm:$0xff] }
 0x128   : > { %v2013_v56 = vpop.eup %2012  ;;  %v869_v58 = vmul.f32 %v2011_v54, %v2421_v2  ;;  %2032 = vpow2.f32 %v1623_v47  ;;  %v1405_v47 = vld [vmem:[%s2735_s5 + $0x20] sm:$0xff]  ;;  %v1408_v54 = vld [vmem:[%s2735_s5 + $0x38] sm:$0xff] }
 0x129   : > { %v2015_v61 = vpop.eup %2014  ;;  %v782_v5 = vadd.f32 1.0, %v2013_v56  ;;  %2034 = vpow2.f32 %v1621_v50  ;;  %v893_v40 = vpack.c.bf16 %v871_v55, %v870_v30  ;;  %v1853_v50 = vpack.c.bf16 %v1406_v48, %v1405_v47  ;;  %v1409_v55 = vld [vmem:[%s2735_s5 + $0x40] sm:$0xff]  ;;  %v1410_v56 = vld [vmem:[%s2735_s5 + $0x48] sm:$0xff] }
 0x12a   : > { %v2017_v60 = vpop.eup %2016  ;;  %v780_v1 = vadd.f32 1.0, %v2015_v61  ;;  %v892_v8 = vpack.c.bf16 %v869_v58, %v868_v57  ;;  %v1856_v30 = vpack.c.bf16 %v1408_v54, %v1407_v53  ;;  %v1859_v57 = vpack.c.bf16 %v1410_v56, %v1409_v55  ;;  %v1411_v58 = vld [vmem:[%s2735_s5 + $0x50] sm:$0xff]  ;;  %v1412_v61 = vld [vmem:[%s2735_s5 + $0x58] sm:$0xff] }
 0x12b   : > { %v2019_v63 = vpop.eup %2018  ;;  %2036 = vrcp.f32 %v782_v5  ;;  %v783_v0 = vadd.f32 1.0, %v2017_v60  ;;  %v1862_v5 = vpack.c.bf16 %v1412_v61, %v1411_v58  ;;  %v1414_v60 = vld [vmem:[%s2735_s5 + $0x68] sm:$0xff] }
 0x12c   : > { %v2021_v51 = vpop.eup %2020  ;;  %2038 = vrcp.f32 %v780_v1  ;;  %v781_v59 = vadd.f32 1.0, %v2019_v63  ;;  %1795 = vmatprep.mubr.bf16.mxu1 %v892_v8  ;;  %v1415_v8 = vld [vmem:[%s2735_s5 + $0x70] sm:$0xff]  ;;  %v1416_v63 = vld [vmem:[%s2735_s5 + $0x78] sm:$0xff] }
 0x12d   : > { %v2023_v3 = vpop.eup %2022  ;;  %2040 = vrcp.f32 %v783_v0  ;;  %v874_v6 = vmul.f32 %v2021_v51, %v2430_v19  ;;  %v1868_v0 = vpack.c.bf16 %v1416_v63, %v1415_v8  ;;  %v2207_v51 = vmov 0.0  }
 0x12e   : > { %v2025_v37 = vpop.eup %2024  ;;  %2042 = vrcp.f32 %v781_v59  ;;  %1796 = vmatmul.mubr.bf16.gmra.mrb[16].mxu1 %v893_v40  ;;  %v872_v10 = vmul.f32 %v2023_v3, %v2433_v49  ;;  %v1413_v40 = vld [vmem:[%s2735_s5 + $0x60] sm:$0xff]  ;;  %1843 = vmatprep.mubr.msk.f32.mxu0 %vm2206_vm3, %v2207_v51 }
 0x12f   : > { %v2027_v2 = vpop.eup %2026  ;;  %v875_v7 = vmul.f32 %v2025_v37, %v2437_v28  ;;  %v1865_v1 = vpack.c.bf16 %v1414_v60, %v1413_v40  ;;  %v2552_v59 = vld [vmem:[%s2734_s4] ss:$0 sm:$0xff] }
 0x130   : > { %v2029_v9 = vpop.eup %2028  ;;  %v873_v11 = vmul.f32 %v2027_v2, %v2441_v36 }
 0x131   : > { %v2031_v12 = vpop.eup %2030  ;;  %v786_v13 = vadd.f32 1.0, %v2029_v9  ;;  %v895_v14 = vpack.c.bf16 %v875_v7, %v874_v6 }
 0x132   : > { %v2033_v15 = vpop.eup %2032  ;;  %v784_v16 = vadd.f32 1.0, %v2031_v12  ;;  %v894_v18 = vpack.c.bf16 %v873_v11, %v872_v10 }
 0x133   : > { %v2035_v20 = vpop.eup %2034  ;;  %2044 = vrcp.f32 %v786_v13  ;;  %v787_v22 = vadd.f32 1.0, %v2033_v15 }
 0x134   : > { %2046 = vrcp.f32 %v784_v16  ;;  %v785_v44 = vadd.f32 1.0, %v2035_v20  ;;  %1799 = vmatprep.mubr.bf16.mxu1 %v894_v18 }
 0x135   : > { %v2037_v19 = vpop.eup %2036  ;;  %2048 = vrcp.f32 %v787_v22 }
 0x136   : > { %v2039_v28 = vpop.eup %2038  ;;  %2050 = vrcp.f32 %v785_v44  ;;  %1800 = vmatmul.mubr.bf16.gmra.mrb[20].mxu1 %v895_v14  ;;  %v878_v36 = vmul.f32 %v2037_v19, %v2450_v32 }
 0x137   : > { %v2041_v49 = vpop.eup %2040  ;;  %v876_v52 = vmul.f32 %v2039_v28, %v2453_v34 }
 0x138   : > { %v2043_v24 = vpop.eup %2042  ;;  %v879_v46 = vmul.f32 %v2041_v49, %v2456_v62 }
 0x139   : > { %v877_v17 = vmul.f32 %v2043_v24, %v2460_v4  ;;  %v1401_v4 = vld [vmem:[%s2735_s5] sm:$0xff] }
 0x13a   : > { %v897_v27 = vpack.c.bf16 %v879_v46, %v878_v36 }
 0x13b   : > { %v896_v25 = vpack.c.bf16 %v877_v17, %v876_v52 }
 0x13d   : > { %v2045_v31 = vpop.eup %2044  ;;  %1803 = vmatprep.mubr.bf16.mxu1 %v896_v25 }
 0x13e   : > { %v2047_v33 = vpop.eup %2046  ;;  %1804 = vmatmul.mubr.bf16.gmra.mrb[24].mxu1 %v897_v27  ;;  %v882_v39 = vmul.f32 %v2045_v31, %v2469_v23  ;;  %v1847_v23 = vpack.c.bf16 %v1402_v45, %v1401_v4 }
 0x13f   : > { %v2049_v35 = vpop.eup %2048  ;;  %v880_v32 = vmul.f32 %v2047_v33, %v2472_v26  ;;  %v1403_v26 = vld [vmem:[%s2735_s5 + $0x10] sm:$0xff] }
 0x140   : > { %v2051_v38 = vpop.eup %2050  ;;  %v883_v42 = vmul.f32 %v2049_v35, %v2476_v29  ;;  %1848 = vmatpush3.bf16.msra.mxu0 %v1847_v23  ;;  %v1404_v29 = vld [vmem:[%s2735_s5 + $0x18] sm:$0xff] }
 0x141   : > { %v881_v62 = vmul.f32 %v2051_v38, %v2480_v41  ;;  %1849 = vmatprep.subr.bf16.mxu0 %v2205_v21  ;;  %v1850_v41 = vpack.c.bf16 %v1404_v29, %v1403_v26 }
 0x142   : > { %v899_v43 = vpack.c.bf16 %v883_v42, %v882_v39 }
 0x143   : > { %v898_v34 = vpack.c.bf16 %v881_v62, %v880_v32 }
 0x144   : > { %1851 = vmatpush3.bf16.msra.mxu0 %v1850_v41 }
 0x145   : > { %1807 = vmatprep.mubr.bf16.mxu1 %v898_v34  ;;  %1852 = vmatprep.subr.bf16.mxu0 %v2205_v21 }
 0x146   : > { %1808 = vmatmul.mubr.bf16.gmra.mrb[28].mxu1 %v899_v43 }
 0x148   : > { %1854 = vmatpush3.bf16.msra.mxu0 %v1853_v50 }
 0x149   : > { %1855 = vmatprep.subr.bf16.mxu0 %v2205_v21 }
 0x14c   : > { %1857 = vmatpush3.bf16.msra.mxu0 %v1856_v30 }
 0x14d   : > { %1858 = vmatprep.subr.bf16.mxu0 %v2205_v21 }
 0x150   : > { %1860 = vmatpush3.bf16.msra.mxu0 %v1859_v57 }
 0x151   : > { %1861 = vmatprep.subr.bf16.mxu0 %v2205_v21 }
 0x154   : > { %1863 = vmatpush3.bf16.msra.mxu0 %v1862_v5 }
 0x155   : > { %1864 = vmatprep.subr.bf16.mxu0 %v2205_v21 }
 0x158   : > { %1866 = vmatpush3.bf16.msra.mxu0 %v1865_v1 }
 0x159   : > { %1867 = vmatprep.subr.bf16.mxu0 %v2205_v21 }
 0x15c   : > { %1869 = vmatpush3.bf16.msra.mxu0 %v1868_v0 }
 0x1de   : > { %v1781_v3 = vpop.f32.mrb[0].mxu1 }
 0x1df   : > { %v2555_v37 = vadd.f32 %v1781_v3, %v2552_v59  ;;  %v1005_v2 = vpop.f32.mrb[1].mxu1 }
 0x1e0   : > { %v2558_v6 = vadd.f32 %v2552_v59, %v1005_v2  ;;  %v1782_v7 = vpop.f32.mrb[2].mxu1 }
 0x1e1   : > { %v1635_v9 = vmul.f32 -1.442695, %v2555_v37  ;;  %v2562_v10 = vadd.f32 %v1782_v7, %v2552_v59  ;;  %v1008_v11 = vpop.f32.mrb[3].mxu1 }
 0x1e2   : > { %v1633_v12 = vmul.f32 -1.442695, %v2558_v6  ;;  %v2566_v13 = vadd.f32 %v2552_v59, %v1008_v11 }
 0x1e3   : > { %2052 = vpow2.f32 %v1635_v9  ;;  %v1636_v14 = vmul.f32 -1.442695, %v2562_v10 }
 0x1e4   : > { %2054 = vpow2.f32 %v1633_v12  ;;  %v1634_v15 = vmul.f32 -1.442695, %v2566_v13 }
 0x1e5   : > { %2056 = vpow2.f32 %v1636_v14 }
 0x1e6   : > { %2058 = vpow2.f32 %v1634_v15  ;;  %v1785_v16 = vpop.f32.mrb[4].mxu1 }
 0x1e7   : > { %v2571_v18 = vadd.f32 %v1785_v16, %v2552_v59  ;;  %v1021_v20 = vpop.f32.mrb[5].mxu1 }
 0x1e8   : > { %v2574_v22 = vadd.f32 %v2552_v59, %v1021_v20  ;;  %v1786_v44 = vpop.f32.mrb[6].mxu1 }
 0x1e9   : > { %v1639_v19 = vmul.f32 -1.442695, %v2571_v18  ;;  %v2578_v28 = vadd.f32 %v1786_v44, %v2552_v59  ;;  %v1024_v49 = vpop.f32.mrb[7].mxu1 }
 0x1ea   : > { %v1637_v24 = vmul.f32 -1.442695, %v2574_v22  ;;  %v2582_v36 = vadd.f32 %v2552_v59, %v1024_v49 }
 0x1eb   : > { %2060 = vpow2.f32 %v1639_v19  ;;  %v1640_v46 = vmul.f32 -1.442695, %v2578_v28 }
 0x1ec   : > { %2062 = vpow2.f32 %v1637_v24  ;;  %v1638_v52 = vmul.f32 -1.442695, %v2582_v36 }
 0x1ed   : > { %v2053_v17 = vpop.eup %2052  ;;  %2064 = vpow2.f32 %v1640_v46 }
 0x1ee   : > { %v2055_v27 = vpop.eup %2054  ;;  %v1230_v25 = vadd.f32 1.0, %v2053_v17  ;;  %2066 = vpow2.f32 %v1638_v52 }
 0x1ef   : > { %v2057_v31 = vpop.eup %2056  ;;  %v1228_v33 = vadd.f32 1.0, %v2055_v27  ;;  %v1789_v35 = vpop.f32.mrb[8].mxu1 }
 0x1f0   : > { %v2059_v38 = vpop.eup %2058  ;;  %2068 = vrcp.f32 %v1230_v25  ;;  %v1231_v39 = vadd.f32 1.0, %v2057_v31  ;;  %v2587_v42 = vadd.f32 %v1789_v35, %v2552_v59  ;;  %v1037_v32 = vpop.f32.mrb[9].mxu1 }
 0x1f1   : > { %2070 = vrcp.f32 %v1228_v33  ;;  %v1229_v62 = vadd.f32 1.0, %v2059_v38  ;;  %v2590_v43 = vadd.f32 %v2552_v59, %v1037_v32  ;;  %v1790_v34 = vpop.f32.mrb[10].mxu1 }
 0x1f2   : > { %2072 = vrcp.f32 %v1231_v39  ;;  %v1643_v4 = vmul.f32 -1.442695, %v2587_v42  ;;  %v2594_v45 = vadd.f32 %v1790_v34, %v2552_v59  ;;  %v1040_v21 = vpop.f32.mrb[11].mxu1 }
 0x1f3   : > { %2074 = vrcp.f32 %v1229_v62  ;;  %v1641_v23 = vmul.f32 -1.442695, %v2590_v43  ;;  %v2598_v26 = vadd.f32 %v2552_v59, %v1040_v21 }
 0x1f4   : > { %2076 = vpow2.f32 %v1643_v4  ;;  %v1644_v29 = vmul.f32 -1.442695, %v2594_v45 }
 0x1f5   : > { %v2061_v41 = vpop.eup %2060  ;;  %2078 = vpow2.f32 %v1641_v23  ;;  %v1642_v47 = vmul.f32 -1.442695, %v2598_v26 }
 0x1f6   : > { %v2063_v48 = vpop.eup %2062  ;;  %v1234_v50 = vadd.f32 1.0, %v2061_v41  ;;  %2080 = vpow2.f32 %v1644_v29 }
 0x1f7   : > { %v2065_v53 = vpop.eup %2064  ;;  %v1232_v54 = vadd.f32 1.0, %v2063_v48  ;;  %2082 = vpow2.f32 %v1642_v47 }
 0x1f8   : > { %v2067_v30 = vpop.eup %2066  ;;  %v1235_v55 = vadd.f32 1.0, %v2065_v53 }
 0x1f9   : > { %2084 = vrcp.f32 %v1232_v54  ;;  %v1233_v56 = vadd.f32 1.0, %v2067_v30  ;;  %v1793_v57 = vpop.f32.mrb[12].mxu1 }
 0x1fa   : > { %v2069_v58 = vpop.eup %2068  ;;  %2086 = vrcp.f32 %v1234_v50  ;;  %v2603_v61 = vadd.f32 %v1793_v57, %v2552_v59  ;;  %v1053_v5 = vpop.f32.mrb[13].mxu1 }
 0x1fb   : > { %v2071_v40 = vpop.eup %2070  ;;  %2088 = vrcp.f32 %v1233_v56  ;;  %v2606_v60 = vadd.f32 %v2552_v59, %v1053_v5  ;;  %v1794_v1 = vpop.f32.mrb[14].mxu1  ;;  %v1326_v44 = vmul.f32 %v2069_v58, %v2555_v37 }
 0x1fc   : > { %v2073_v8 = vpop.eup %2072  ;;  %2090 = vrcp.f32 %v1235_v55  ;;  %v1647_v63 = vmul.f32 -1.442695, %v2603_v61  ;;  %v2610_v0 = vadd.f32 %v1794_v1, %v2552_v59  ;;  %v1056_v51 = vpop.f32.mrb[15].mxu1  ;;  %v1324_v11 = vmul.f32 %v2071_v40, %v2558_v6 }
 0x1fd   : > { %v2075_v3 = vpop.eup %2074  ;;  %v1645_v2 = vmul.f32 -1.442695, %v2606_v60  ;;  %v2614_v7 = vadd.f32 %v2552_v59, %v1056_v51  ;;  %v1327_v46 = vmul.f32 %v2073_v8, %v2562_v10 }
 0x1fe   : > { %v2077_v9 = vpop.eup %2076  ;;  %v1325_v12 = vmul.f32 %v2075_v3, %v2566_v13  ;;  %2092 = vpow2.f32 %v1647_v63  ;;  %v1648_v14 = vmul.f32 -1.442695, %v2610_v0 }
 0x1ff   : > { %v2079_v15 = vpop.eup %2078  ;;  %v1238_v16 = vadd.f32 1.0, %v2077_v9  ;;  %2094 = vpow2.f32 %v1645_v2  ;;  %v1646_v6 = vmul.f32 -1.442695, %v2614_v7 }
 0x200   : > { %v2081_v20 = vpop.eup %2080  ;;  %v1357_v19 = vadd.f32 %v1325_v12, %v1324_v11  ;;  %v1236_v49 = vadd.f32 1.0, %v2079_v15  ;;  %2096 = vpow2.f32 %v1648_v14 }
 0x201   : > { %v2083_v24 = vpop.eup %2082  ;;  %2098 = vrcp.f32 %v1238_v16  ;;  %v1239_v52 = vadd.f32 1.0, %v2081_v20  ;;  %v1797_v13 = vpop.f32.mrb[16].mxu1 }
 0x202   : > { %v1358_v17 = vadd.f32 %v1357_v19, %v1326_v44  ;;  %2100 = vrcp.f32 %v1236_v49  ;;  %v1237_v27 = vadd.f32 1.0, %v2083_v24  ;;  %v2623_v25 = vadd.f32 %v1797_v13, %v2552_v59  ;;  %v1069_v31 = vpop.f32.mrb[17].mxu1 }
 0x203   : > { %v2085_v33 = vpop.eup %2084  ;;  %2102 = vrcp.f32 %v1239_v52  ;;  %v2626_v37 = vadd.f32 %v2552_v59, %v1069_v31  ;;  %v1798_v35 = vpop.f32.mrb[18].mxu1 }
 0x204   : > { %v2087_v38 = vpop.eup %2086  ;;  %v1328_v10 = vmul.f32 %v2085_v33, %v2574_v22  ;;  %v1359_v39 = vadd.f32 %v1358_v17, %v1327_v46  ;;  %2104 = vrcp.f32 %v1237_v27  ;;  %v1651_v32 = vmul.f32 -1.442695, %v2623_v25  ;;  %v1072_v62 = vpop.f32.mrb[19].mxu1 }
 0x205   : > { %v2089_v34 = vpop.eup %2088  ;;  %2106 = vpow2.f32 %v1646_v6  ;;  %v1649_v4 = vmul.f32 -1.442695, %v2626_v37  ;;  %v2632_v21 = vadd.f32 %v1798_v35, %v2552_v59  ;;  %v2636_v47 = vadd.f32 %v2552_v59, %v1072_v62 }
 0x206   : > { %v2091_v23 = vpop.eup %2090  ;;  %v1360_v29 = vadd.f32 %v1359_v39, %v1328_v10  ;;  %v1329_v41 = vmul.f32 %v2089_v34, %v2582_v36  ;;  %2108 = vpow2.f32 %v1651_v32  ;;  %v1330_v50 = vmul.f32 %v2087_v38, %v2571_v18 }
 0x207   : > { %2110 = vpow2.f32 %v1649_v4  ;;  %v1652_v22 = vmul.f32 -1.442695, %v2632_v21  ;;  %v1650_v54 = vmul.f32 -1.442695, %v2636_v47  ;;  %v1331_v55 = vmul.f32 %v2091_v23, %v2578_v28 }
 0x208   : > { %v2093_v48 = vpop.eup %2092  ;;  %v1361_v53 = vadd.f32 %v1360_v29, %v1329_v41 }
 0x209   : > { %v2095_v30 = vpop.eup %2094  ;;  %2112 = vpow2.f32 %v1652_v22  ;;  %v1801_v56 = vpop.f32.mrb[20].mxu1  ;;  %v1242_v3 = vadd.f32 1.0, %v2093_v48 }
 0x20a   : > { %v2097_v57 = vpop.eup %2096  ;;  %v1362_v36 = vadd.f32 %v1361_v53, %v1330_v50  ;;  %v1240_v58 = vadd.f32 1.0, %v2095_v30  ;;  %2114 = vpow2.f32 %v1650_v54  ;;  %v2643_v5 = vadd.f32 %v1801_v56, %v2552_v59  ;;  %v1085_v40 = vpop.f32.mrb[21].mxu1 }
 0x20b   : > { %v2099_v1 = vpop.eup %2098  ;;  %v2646_v8 = vadd.f32 %v2552_v59, %v1085_v40  ;;  %v1802_v18 = vpop.f32.mrb[22].mxu1  ;;  %v1243_v12 = vadd.f32 1.0, %v2097_v57 }
 0x20c   : > { %v2101_v63 = vpop.eup %2100  ;;  %v1363_v51 = vadd.f32 %v1362_v36, %v1331_v55  ;;  %2116 = vrcp.f32 %v1240_v58  ;;  %v1655_v28 = vmul.f32 -1.442695, %v2643_v5  ;;  %v1088_v2 = vpop.f32.mrb[23].mxu1  ;;  %v2652_v15 = vadd.f32 %v1802_v18, %v2552_v59 }
 0x20d   : > { %v2103_v9 = vpop.eup %2102  ;;  %v1332_v11 = vmul.f32 %v2101_v63, %v2590_v43  ;;  %v1653_v14 = vmul.f32 -1.442695, %v2646_v8  ;;  %v2655_v20 = vadd.f32 %v2552_v59, %v1088_v2  ;;  %v1334_v6 = vmul.f32 %v2099_v1, %v2587_v42 }
 0x20e   : > { %v2105_v16 = vpop.eup %2104  ;;  %2118 = vpow2.f32 %v1655_v28  ;;  %v1656_v24 = vmul.f32 -1.442695, %v2652_v15  ;;  %v1335_v10 = vmul.f32 %v2103_v9, %v2594_v45 }
 0x20f   : > { %v2107_v44 = vpop.eup %2106  ;;  %v1364_v19 = vadd.f32 %v1363_v51, %v1332_v11  ;;  %v1333_v49 = vmul.f32 %v2105_v16, %v2598_v26  ;;  %2120 = vpow2.f32 %v1653_v14  ;;  %v1654_v17 = vmul.f32 -1.442695, %v2655_v20 }
 0x210   : > { %v2109_v46 = vpop.eup %2108  ;;  %2122 = vrcp.f32 %v1242_v3  ;;  %v1241_v43 = vadd.f32 1.0, %v2107_v44 }
 0x211   : > { %v2111_v52 = vpop.eup %2110  ;;  %v1365_v13 = vadd.f32 %v1364_v19, %v1333_v49  ;;  %2124 = vrcp.f32 %v1243_v12  ;;  %v1805_v27 = vpop.f32.mrb[24].mxu1  ;;  %v1246_v31 = vadd.f32 1.0, %v2109_v46 }
 0x212   : > { %2126 = vrcp.f32 %v1241_v43  ;;  %v1244_v33 = vadd.f32 1.0, %v2111_v52  ;;  %v2662_v35 = vadd.f32 %v1805_v27, %v2552_v59  ;;  %v1101_v26 = vpop.f32.mrb[25].mxu1 }
 0x213   : > { %v2113_v38 = vpop.eup %2112  ;;  %v1366_v39 = vadd.f32 %v1365_v13, %v1334_v6  ;;  %2128 = vpow2.f32 %v1656_v24  ;;  %v2666_v32 = vadd.f32 %v2552_v59, %v1101_v26  ;;  %v1806_v42 = vpop.f32.mrb[26].mxu1 }
 0x214   : > { %v2115_v62 = vpop.eup %2114  ;;  %2130 = vrcp.f32 %v1244_v33  ;;  %v1659_v34 = vmul.f32 -1.442695, %v2662_v35  ;;  %v2670_v4 = vadd.f32 %v1806_v42, %v2552_v59  ;;  %v1104_v23 = vpop.f32.mrb[27].mxu1  ;;  %v1247_v48 = vadd.f32 1.0, %v2113_v38 }
 0x215   : > { %v1367_v29 = vadd.f32 %v1366_v39, %v1335_v10  ;;  %v1245_v41 = vadd.f32 1.0, %v2115_v62  ;;  %2132 = vpow2.f32 %v1654_v17  ;;  %v1657_v22 = vmul.f32 -1.442695, %v2666_v32 }
 0x216   : > { %v2117_v45 = vpop.eup %2116  ;;  %2134 = vrcp.f32 %v1246_v31  ;;  %v2674_v50 = vadd.f32 %v2552_v59, %v1104_v23  ;;  %v1660_v54 = vmul.f32 -1.442695, %v2670_v4 }
 0x217   : > { %v1336_v53 = vmul.f32 %v2117_v45, %v2606_v60  ;;  %2136 = vrcp.f32 %v1245_v41 }
 0x218   : > { %v2119_v30 = vpop.eup %2118  ;;  %2138 = vpow2.f32 %v1659_v34  ;;  %v1658_v57 = vmul.f32 -1.442695, %v2674_v50 }
 0x219   : > { %v2121_v55 = vpop.eup %2120  ;;  %v1368_v56 = vadd.f32 %v1367_v29, %v1336_v53  ;;  %2140 = vpow2.f32 %v1657_v22  ;;  %v1809_v36 = vpop.f32.mrb[28].mxu1  ;;  %v1250_v40 = vadd.f32 1.0, %v2119_v30 }
 0x21a   : > { %v2123_v58 = vpop.eup %2122  ;;  %2142 = vrcp.f32 %v1247_v48  ;;  %v1248_v1 = vadd.f32 1.0, %v2121_v55  ;;  %v2680_v18 = vadd.f32 %v1809_v36, %v2552_v59  ;;  %v1117_v63 = vpop.f32.mrb[29].mxu1 }
 0x21b   : > { %v2125_v60 = vpop.eup %2124  ;;  %2144 = vpow2.f32 %v1660_v54  ;;  %v2683_v51 = vadd.f32 %v2552_v59, %v1117_v63  ;;  %v1810_v3 = vpop.f32.mrb[30].mxu1  ;;  %v1338_v46 = vmul.f32 %v2123_v58, %v2603_v61 }
 0x21c   : > { %v2127_v28 = vpop.eup %2126  ;;  %2146 = vrcp.f32 %v1248_v1  ;;  %v1663_v2 = vmul.f32 -1.442695, %v2680_v18  ;;  %v2687_v9 = vadd.f32 %v1810_v3, %v2552_v59  ;;  %v1120_v11 = vpop.f32.mrb[31].mxu1  ;;  %v1339_v27 = vmul.f32 %v2125_v60, %v2610_v0 }
 0x21d   : > { %v2129_v12 = vpop.eup %2128  ;;  %v1337_v14 = vmul.f32 %v2127_v28, %v2614_v7  ;;  %2148 = vpow2.f32 %v1658_v57  ;;  %v1661_v16 = vmul.f32 -1.442695, %v2683_v51  ;;  %v2692_v44 = vadd.f32 %v2552_v59, %v1120_v11 }
 0x21e   : > { %v2131_v19 = vpop.eup %2130  ;;  %2150 = vrcp.f32 %v1250_v40  ;;  %v1664_v49 = vmul.f32 -1.442695, %v2687_v9  ;;  %v1251_v13 = vadd.f32 1.0, %v2129_v12 }
 0x21f   : > { %v2133_v24 = vpop.eup %2132  ;;  %v1369_v43 = vadd.f32 %v1368_v56, %v1337_v14  ;;  %2152 = vpow2.f32 %v1663_v2  ;;  %v1662_v52 = vmul.f32 -1.442695, %v2692_v44  ;;  %v1340_v31 = vmul.f32 %v2131_v19, %v2626_v37 }
 0x220   : > { %v2135_v6 = vpop.eup %2134  ;;  %v1249_v7 = vadd.f32 1.0, %v2133_v24  ;;  %2154 = vpow2.f32 %v1661_v16 }
 0x221   : > { %v2137_v17 = vpop.eup %2136  ;;  %v1370_v59 = vadd.f32 %v1369_v43, %v1338_v46  ;;  %2156 = vpow2.f32 %v1664_v49  ;;  %v1342_v29 = vmul.f32 %v2135_v6, %v2623_v25 }
 0x222   : > { %v2139_v33 = vpop.eup %2138  ;;  %2158 = vrcp.f32 %v1249_v7  ;;  %v1341_v61 = vmul.f32 %v2137_v17, %v2636_v47 }
 0x223   : > { %v2141_v26 = vpop.eup %2140  ;;  %v1371_v38 = vadd.f32 %v1370_v59, %v1339_v27  ;;  %2160 = vpow2.f32 %v1662_v52  ;;  %v1254_v34 = vadd.f32 1.0, %v2139_v33 }
 0x224   : > { %v2143_v10 = vpop.eup %2142  ;;  %2162 = vrcp.f32 %v1251_v13  ;;  %v1252_v39 = vadd.f32 1.0, %v2141_v26 }
 0x225   : > { %v2145_v42 = vpop.eup %2144  ;;  %v1372_v62 = vadd.f32 %v1371_v38, %v1340_v31  ;;  %v1343_v53 = vmul.f32 %v2143_v10, %v2632_v21 }
 0x226   : > { %v2147_v23 = vpop.eup %2146  ;;  %2164 = vrcp.f32 %v1252_v39  ;;  %v1255_v22 = vadd.f32 1.0, %v2145_v42 }
 0x227   : > { %v2149_v0 = vpop.eup %2148  ;;  %v1373_v37 = vadd.f32 %v1372_v62, %v1341_v61  ;;  %v1344_v54 = vmul.f32 %v2147_v23, %v2646_v8  ;;  %2166 = vrcp.f32 %v1254_v34 }
 0x228   : > { %v2151_v41 = vpop.eup %2150  ;;  %v1253_v45 = vadd.f32 1.0, %v2149_v0 }
 0x229   : > { %v2153_v48 = vpop.eup %2152  ;;  %v1374_v47 = vadd.f32 %v1373_v37, %v1342_v29  ;;  %v1346_v21 = vmul.f32 %v2151_v41, %v2643_v5 }
 0x22a   : > { %v2155_v30 = vpop.eup %2154  ;;  %2168 = vrcp.f32 %v1253_v45  ;;  %v1258_v63 = vadd.f32 1.0, %v2153_v48 }
 0x22b   : > { %v2157_v55 = vpop.eup %2156  ;;  %v1375_v56 = vadd.f32 %v1374_v47, %v1343_v53  ;;  %v1256_v57 = vadd.f32 1.0, %v2155_v30  ;;  %2170 = vrcp.f32 %v1255_v22 }
 0x22c   : > { %v2159_v36 = vpop.eup %2158  ;;  %v1259_v28 = vadd.f32 1.0, %v2157_v55 }
 0x22d   : > { %v2161_v58 = vpop.eup %2160  ;;  %v1376_v25 = vadd.f32 %v1375_v56, %v1344_v54  ;;  %v1345_v40 = vmul.f32 %v2159_v36, %v2655_v20  ;;  %2172 = vrcp.f32 %v1256_v57 }
 0x22e   : > { %v2163_v1 = vpop.eup %2162  ;;  %v1257_v60 = vadd.f32 1.0, %v2161_v58 }
 0x22f   : > { %v1377_v3 = vadd.f32 %v1376_v25, %v1345_v40  ;;  %v1347_v2 = vmul.f32 %v2163_v1, %v2652_v15 }
 0x230   : > { %v2165_v8 = vpop.eup %2164  ;;  %2174 = vrcp.f32 %v1257_v60 }
 0x231   : > { %v1378_v11 = vadd.f32 %v1377_v3, %v1346_v21  ;;  %v1348_v12 = vmul.f32 %v2165_v8, %v2666_v32  ;;  %2176 = vrcp.f32 %v1258_v63  ;;  %v2167_v14 = vpop.eup %2166 }
 0x232   : > { %2178 = vrcp.f32 %v1259_v28  ;;  %v1350_v5 = vmul.f32 %v2167_v14, %v2662_v35 }
 0x233   : > { %v1379_v16 = vadd.f32 %v1378_v11, %v1347_v2 }
 0x234   : > { %v2169_v19 = vpop.eup %2168 }
 0x235   : > { %v1380_v20 = vadd.f32 %v1379_v16, %v1348_v12  ;;  %v1349_v49 = vmul.f32 %v2169_v19, %v2674_v50  ;;  %v2171_v24 = vpop.eup %2170 }
 0x236   : > { %v1351_v52 = vmul.f32 %v2171_v24, %v2670_v4 }
 0x237   : > { %v2173_v46 = vpop.eup %2172  ;;  %v1381_v43 = vadd.f32 %v1380_v20, %v1349_v49 }
 0x238   : > { %v1352_v15 = vmul.f32 %v2173_v46, %v2683_v51 }
 0x239   : > { %v1382_v6 = vadd.f32 %v1381_v43, %v1350_v5 }
 0x23a   : > { %v2175_v13 = vpop.eup %2174 }
 0x23b   : > { %v1383_v32 = vadd.f32 %v1382_v6, %v1351_v52  ;;  %v1353_v7 = vmul.f32 %v2175_v13, %v2692_v44  ;;  %v2177_v17 = vpop.eup %2176  ;;  %v1417_v44 = vld [vmem:[%s2736_s6] sm:$0x1] }
 0x23c   : > { %v2179_v59 = vpop.eup %2178  ;;  %v1354_v50 = vmul.f32 %v2177_v17, %v2680_v18 }
 0x23d   : > { %v1384_v27 = vadd.f32 %v1383_v32, %v1352_v15  ;;  %v1355_v33 = vmul.f32 %v2179_v59, %v2687_v9 }
 0x23f   : > { %v1385_v31 = vadd.f32 %v1384_v27, %v1353_v7 }
 0x241   : > { %v1386_v35 = vadd.f32 %v1385_v31, %v1354_v50 }
 0x243   : > { %v1387_v26 = vadd.f32 %v1386_v35, %v1355_v33 }
 0x245   : > { %v1394_v38 = vrot.slane %v1387_v26, 4 }
 0x247   : > { %v1395_v4 = vadd.f32 %v1394_v38, %v1387_v26 }
 0x249   : > { %v1396_v61 = vrot.slane %v1395_v4, 2 }
 0x24b   : > { %v1397_v10 = vadd.f32 %v1396_v61, %v1395_v4 }
 0x24d   : > { %v1398_v51 = vrot.slane %v1397_v10, 1 }
 0x24f   : > { %v1399_v39 = vadd.f32 %v1398_v51, %v1397_v10 }
 0x251   : > { %v1400_v42 = vmul.f32 0.00390625, %v1399_v39 }
 0x253   : > { %1844 = vmatmul.mubr.f32.vlgmr.msra.gmra.mrb[32].mxu0 %v1400_v42 }
 0x326   : > { %v1484_v18 = vpop.f32.mrb[32].mxu0 }
 0x327   : > { %v1485_v9 = vadd.f32 %v1484_v18, %v1417_v44  ;;  %v1845_v62 = vpop.f32.mrb[33].mxu0 }
 0x329   : > { %1488 = vst [vmem:[%s302_s12] sm:$0x1] %v1485_v9 }
 0x32a PF: > { %s17_s26 = sadd.s32 1, %s2202_s26   ;;  %s2738_s24 = smov %s2198_s25 }
 0x32b   : > { %p14_p5 = scmp.ge.s32.totalorder %s17_s26, 4   ;;  %s2739_s25 = smov %s2741_s27 }
 0x32d   :  { %16 = sbr.rel (!%p14_p5) target bundleno = 2 (0x2), region = 86 }

</bundles_post_ra>
